<compile_context>
chip_gen: v7x
topology: tpu7x:2x2x1
jax: 0.10.0
libtpu: 0.0.40
codegen_flags: <defaults>
</compile_context>

<pallas_src>
import jax
import jax.numpy as jnp
from jax import lax
from jax.experimental import pallas as pl
from jax.experimental.pallas import tpu as pltpu


def _transition_kernel(x_ref, scale_ref, shift_ref, w_ref, o_ref):
    # x_ref:     (1, 4, C, tS)   4 = flattened 2x2 pool window
    # scale_ref: (C, 1)          folded BN scale  = gamma / sqrt(var + eps)
    # shift_ref: (C, 1)          folded BN shift  = beta - mean * scale
    # w_ref:     (OC, C)         1x1 conv weight
    # o_ref:     (1, OC, tS)
    x = x_ref[...].astype(jnp.float32)                     # keep HBM dtype native; f32 in-kernel
    c = x.shape[2]
    scale = scale_ref[...].reshape(1, 1, c, 1)
    shift = shift_ref[...].reshape(1, 1, c, 1)
    a = jnp.maximum(x * scale + shift, 0.0)                # BN (inference) + ReLU
    pooled = jnp.mean(a, axis=1)                           # (1, C, tS): 2x2 avg pool (window axis)
    w = w_ref[...].astype(jnp.float32)                     # (OC, C)
    y = lax.dot_general(w, pooled[0],
                        dimension_numbers=(((1,), (0,)), ((), ())),
                        preferred_element_type=jnp.float32)  # (OC, tS) on the MXU
    o_ref[...] = y[None].astype(o_ref.dtype)


def _pick_spatial_tile(S, cap=512):
    """Largest valid spatial tile: full S if small, else a multiple of 128 dividing S."""
    if S <= cap:
        return S
    if S % 128 == 0:
        t = (cap // 128) * 128
        while t >= 128:
            if S % t == 0:
                return t
            t -= 128
    return S  # no clean 128-multiple tiling; fall back to the full axis


def transition_forward(x, gamma, beta, running_mean, running_var, conv_w, eps=1e-5):
    """x: (B, C, H, W); conv_w: (OC, C) (1x1 conv weight squeezed).
    Returns (B, OC, H//2, W//2), matching Transition.forward with eval-mode BN."""
    B, C, H, W = x.shape
    assert H % 2 == 0 and W % 2 == 0, "avg_pool2d(2) needs even H, W"
    OC = conv_w.shape[0]
    Hp, Wp = H // 2, W // 2
    S = Hp * Wp

    # Fold BN (inference) into per-channel scale/shift, f32.
    scale = (gamma.astype(jnp.float32) /
             jnp.sqrt(running_var.astype(jnp.float32) + eps))
    shift = beta.astype(jnp.float32) - running_mean.astype(jnp.float32) * scale
    scale = scale.reshape(C, 1)
    shift = shift.reshape(C, 1)

    # (B, C, H, W) -> (B, 4, C, Hp*Wp): window axis separated, pooled spatial lane-dense.
    x4 = (x.reshape(B, C, Hp, 2, Wp, 2)
           .transpose(0, 3, 5, 1, 2, 4)
           .reshape(B, 4, C, S))

    tS = _pick_spatial_tile(S)
    n_s = S // tS

    out = pl.pallas_call(
        _transition_kernel,
        out_shape=jax.ShapeDtypeStruct((B, OC, S), x.dtype),
        grid_spec=pltpu.PrefetchScalarGridSpec(
            num_scalar_prefetch=0,
            grid=(B, n_s),
            in_specs=[
                pl.BlockSpec((1, 4, C, tS), lambda b, s: (b, 0, 0, s)),
                pl.BlockSpec((C, 1), lambda b, s: (0, 0)),
                pl.BlockSpec((C, 1), lambda b, s: (0, 0)),
                pl.BlockSpec((OC, C), lambda b, s: (0, 0)),
            ],
            out_specs=pl.BlockSpec((1, OC, tS), lambda b, s: (b, 0, s)),
        ),
        compiler_params=pltpu.CompilerParams(
            dimension_semantics=("parallel", "parallel"),
        ),
    )(x4, scale, shift, conv_w.astype(jnp.float32))
    return out.reshape(B, OC, Hp, Wp)


def transition_ref(x, gamma, beta, running_mean, running_var, conv_w, eps=1e-5):
    """Pure-JAX reference in the module's op order: bn -> relu -> conv1x1 -> avg_pool2d(2)."""
    x = x.astype(jnp.float32)
    inv = 1.0 / jnp.sqrt(running_var.astype(jnp.float32) + eps)
    xn = (x - running_mean[None, :, None, None]) * inv[None, :, None, None]
    a = jnp.maximum(xn * gamma[None, :, None, None] + beta[None, :, None, None], 0.0)
    y = jnp.einsum('oc,bchw->bohw', conv_w.astype(jnp.float32), a)
    Bb, O, H, W = y.shape
    return y.reshape(Bb, O, H // 2, 2, W // 2, 2).mean(axis=(3, 5))


if __name__ == "__main__":
    key = jax.random.PRNGKey(0)
    B, C, OC, H, W = 2, 4, 8, 16, 16
    k1, k2, k3, k4, k5, k6 = jax.random.split(key, 6)
    x = jax.random.normal(k1, (B, C, H, W), dtype=jnp.float32)
    gamma = 1.0 + 0.1 * jax.random.normal(k2, (C,), dtype=jnp.float32)
    beta = 0.1 * jax.random.normal(k3, (C,), dtype=jnp.float32)
    running_mean = 0.1 * jax.random.normal(k4, (C,), dtype=jnp.float32)
    running_var = jax.random.uniform(k5, (C,), dtype=jnp.float32, minval=0.5, maxval=1.5)
    conv_w = jax.random.normal(k6, (OC, C), dtype=jnp.float32) / jnp.sqrt(C)

    y = transition_forward(x, gamma, beta, running_mean, running_var, conv_w)
    jax.block_until_ready(y)

    y_ref = transition_ref(x, gamma, beta, running_mean, running_var, conv_w)
    assert y.shape == (B, OC, H // 2, W // 2), f"bad shape {y.shape}"
    max_err = float(jnp.max(jnp.abs(y.astype(jnp.float32) - y_ref)))
    assert jnp.allclose(y.astype(jnp.float32), y_ref, rtol=1e-4, atol=1e-5), (
        f"mismatch vs reference, max abs err {max_err}")
    print("KERNEL_OK")
</pallas_src>

<mosaic_0001>
module attributes {stable_mosaic.version = 11 : i64} {
  func.func @_transition_kernel(%arg0: i32, %arg1: i32, %arg2: memref<1x4x4x64xf32, #tpu.memory_space<vmem>>, %arg3: memref<4x1xf32, #tpu.memory_space<vmem>>, %arg4: memref<4x1xf32, #tpu.memory_space<vmem>>, %arg5: memref<8x4xf32, #tpu.memory_space<vmem>>, %arg6: memref<1x8x64xf32, #tpu.memory_space<vmem>>) attributes {dimension_semantics = [#tpu.dimension_semantics<parallel>, #tpu.dimension_semantics<parallel>], iteration_bounds = array<i64: 2, 1>, scalar_prefetch = 0 : i64, scratch_operands = 0 : i64, tpu.core_type = #tpu.core_type<tc>, window_params = [{transform_indices = @transform_0, window_bounds = array<i64: 1, 4, 4, 64>}, {pipeline_mode = #tpu.pipeline_mode<synchronous>, transform_indices = @transform_1, window_bounds = array<i64: 4, 1>}, {pipeline_mode = #tpu.pipeline_mode<synchronous>, transform_indices = @transform_2, window_bounds = array<i64: 4, 1>}, {pipeline_mode = #tpu.pipeline_mode<synchronous>, transform_indices = @transform_3, window_bounds = array<i64: 8, 4>}, {transform_indices = @transform_4, window_bounds = array<i64: 1, 8, 64>}]} {
    %c0 = arith.constant 0 : index
    %c0_0 = arith.constant 0 : index
    %c0_1 = arith.constant 0 : index
    %c0_2 = arith.constant 0 : index
    %0 = vector.load %arg2[%c0, %c0_0, %c0_1, %c0_2] : memref<1x4x4x64xf32, #tpu.memory_space<vmem>>, vector<1x4x4x64xf32>
    %c0_3 = arith.constant 0 : index
    %c0_4 = arith.constant 0 : index
    %1 = vector.load %arg3[%c0_3, %c0_4] : memref<4x1xf32, #tpu.memory_space<vmem>>, vector<4x1xf32>
    %2 = vector.shape_cast %1 : vector<4x1xf32> to vector<1x1x4x1xf32>
    %c0_5 = arith.constant 0 : index
    %c0_6 = arith.constant 0 : index
    %3 = vector.load %arg4[%c0_5, %c0_6] : memref<4x1xf32, #tpu.memory_space<vmem>>, vector<4x1xf32>
    %4 = vector.shape_cast %3 : vector<4x1xf32> to vector<1x1x4x1xf32>
    %5 = vector.broadcast %2 : vector<1x1x4x1xf32> to vector<1x4x4x64xf32>
    %6 = arith.mulf %0, %5 : vector<1x4x4x64xf32>
    %7 = vector.broadcast %4 : vector<1x1x4x1xf32> to vector<1x4x4x64xf32>
    %8 = arith.addf %6, %7 : vector<1x4x4x64xf32>
    %cst = arith.constant 0.000000e+00 : f32
    %9 = vector.broadcast %cst : f32 to vector<1x4x4x64xf32>
    %10 = arith.maximumf %8, %9 : vector<1x4x4x64xf32>
    %cst_7 = arith.constant dense<0.000000e+00> : vector<1x4x64xf32>
    %11 = vector.multi_reduction <add>, %10, %cst_7 [1] : vector<1x4x4x64xf32> to vector<1x4x64xf32>
    %cst_8 = arith.constant 4.000000e+00 : f32
    %12 = vector.broadcast %cst_8 : f32 to vector<1x4x64xf32>
    %13 = arith.divf %11, %12 : vector<1x4x64xf32>
    %c0_9 = arith.constant 0 : index
    %c0_10 = arith.constant 0 : index
    %14 = vector.load %arg5[%c0_9, %c0_10] : memref<8x4xf32, #tpu.memory_space<vmem>>, vector<8x4xf32>
    %15 = vector.shape_cast %13 : vector<1x4x64xf32> to vector<4x64xf32>
    %cst_11 = arith.constant dense<0.000000e+00> : vector<8x64xf32>
    %16 = tpu.matmul %14, %15, %cst_11 {dimension_numbers = #tpu.dot_dimension_numbers<[1], [0], [0], [1], [0, 0, 1, 1], [], []>} : vector<8x4xf32>, vector<4x64xf32>, vector<8x64xf32> -> vector<8x64xf32>
    %17 = vector.shape_cast %16 : vector<8x64xf32> to vector<1x8x64xf32>
    %c0_12 = arith.constant 0 : index
    %c0_13 = arith.constant 0 : index
    %c0_14 = arith.constant 0 : index
    %18 = vector.load %arg6[%c0_12, %c0_13, %c0_14] : memref<1x8x64xf32, #tpu.memory_space<vmem>>, vector<1x8x64xf32>
    tpu.vector_store %arg6[%c0_12, %c0_13, %c0_14], %17 {strides = array<i32>} : memref<1x8x64xf32, #tpu.memory_space<vmem>>, vector<1x8x64xf32>,
    return
  }
  func.func @transform_0(%arg0: i32, %arg1: i32) -> (i32, i32, i32, i32) {
    %c0_i32 = arith.constant 0 : i32
    %c0_i32_0 = arith.constant 0 : i32
    %c0_i32_1 = arith.constant 0 : i32
    return %arg0, %c0_i32, %c0_i32_0, %arg1 : i32, i32, i32, i32
  }
  func.func @transform_1(%arg0: i32, %arg1: i32) -> (i32, i32) {
    %c0_i32 = arith.constant 0 : i32
    %c0_i32_0 = arith.constant 0 : i32
    %c0_i32_1 = arith.constant 0 : i32
    return %c0_i32, %c0_i32_0 : i32, i32
  }
  func.func @transform_2(%arg0: i32, %arg1: i32) -> (i32, i32) {
    %c0_i32 = arith.constant 0 : i32
    %c0_i32_0 = arith.constant 0 : i32
    %c0_i32_1 = arith.constant 0 : i32
    return %c0_i32, %c0_i32_0 : i32, i32
  }
  func.func @transform_3(%arg0: i32, %arg1: i32) -> (i32, i32) {
    %c0_i32 = arith.constant 0 : i32
    %c0_i32_0 = arith.constant 0 : i32
    %c0_i32_1 = arith.constant 0 : i32
    return %c0_i32, %c0_i32_0 : i32, i32
  }
  func.func @transform_4(%arg0: i32, %arg1: i32) -> (i32, i32, i32) {
    %c0_i32 = arith.constant 0 : i32
    %c0_i32_0 = arith.constant 0 : i32
    return %arg0, %c0_i32, %arg1 : i32, i32, i32
  }
}

</mosaic_0001>

<bundles_post_ra>
// kernel: tpu_custom_call.1
= control target key start
LH: loop header
LB: loop body
LE: loop exit
PB: predicated region body
PF: predicated region fallthrough
CT: control target
= control target key end

     0   :  { %9 = vsyncpa [#allocation3], 0  ;;  %s869_s0 = inlined_call_operand.hbm [shape: f32[2,4,4,64], index: 0, kind: input, shape index: {}]   ;;  %s870_s1 = inlined_call_operand.vmem [shape: f32[4,1], index: 1, kind: input, shape index: {}]   ;;  %s871_s2 = inlined_call_operand.vmem [shape: f32[4,1], index: 2, kind: input, shape index: {}]   ;;  %s872_s3 = inlined_call_operand.vmem [shape: f32[8,4], index: 3, kind: input, shape index: {}]   ;;  %s873_s4 = inlined_call_operand.hbm [shape: f32[2,8,64], index: 4, kind: output, shape index: {}]  }
   0x1   :  { %11 = vsyncpa [#allocation3 + $0x1], 0 }
   0x2   :  { %12 = vsyncpa [#allocation4], 0 }
   0x3   :  { %14 = vsyncpa [#allocation4 + $0x1], 0  ;;  %s686_s15 = smov 0   ;;  %s688_s16 = smov 0  }
   0x4   :  { %s690_s17 = smov 0   ;;  %s692_s18 = smov 0  }
   0x5   :  { %s694_s19 = smov 0   ;;  %s696_s20 = smov 0  }
   0x6 LB: > { %s448_s21 = sadd.s32 4294967295, %s652_s20   ;;  %s449_s22 = sadd.s32 4294967294, %s652_s20   ;;  %s652_s20 = sphi %s696_s20, %s20_s20   ;;  %s648_s19 = sphi %s694_s19, %s888_s19   ;;  %s644_s18 = sphi %s692_s18, %s887_s18   ;;  %s640_s17 = sphi %s690_s17, %s886_s17   ;;  %s636_s16 = sphi %s688_s16, %s885_s16   ;;  %s632_s15 = sphi %s686_s15, %s884_s15  }
   0x7   : > { %s32_s23 = sadd.s32 1, %s648_s19  ;;  %s41_s24 = sadd.s32 1, %s640_s17 }
   0x8   : > { %p34_p0 = scmp.ge.s32.totalorder %s32_s23, 2  ;;  %p48_p1 = scmp.ne.s32.totalorder %s640_s17, %s636_s16 }
   0x9   : > { %p49_p2 = scmp.eq.s32.totalorder %s652_s20, 0  ;;  %p54_p3 = scmp.ne.s32.totalorder %s636_s16, %s632_s15 }
   0xa   : > { %s890_s23 = smov (%p34_p0, %s32_s23), 0  ;;  %p55_p5 = scmp.eq.s32.totalorder %s448_s21, 0 }
   0xb   : > { %p727_p4 = por %p49_p2, %p48_p1  ;;  %s36_s26 = ssub.s32 %s648_s19, %s890_s23 }
   0xc   : > { %p143_p6 = scmp.eq.s32.totalorder %s448_s21, 1  ;;  %p39_p7 = scmp.eq.s32.totalorder %s36_s26, 0 }
   0xd   : > { %p733_p8 = por %p55_p5, %p54_p3  ;;  %p149_p10 = scmp.eq.s32.totalorder %s449_s22, 1 }
   0xe   : > { %p737_p9 = por %p143_p6, %p48_p1  ;;  %p484_p13 = scmp.lt.s32.totalorder %s652_s20, 2 }
   0xf   : > { %s742_s29 = scalar_select %p39_p7, %s640_s17, %s41_s24  }
  0x10   : > { %s877_s28 = scalar_select %p737_p9, 1, 0 }
  0x11   : > { %p744_p11 = por %p149_p10, %p54_p3  ;;  %s178_s5 = sand.u32 1, %s640_s17  }
  0x12   : > { %s452_s6 = sshll.u32 %s178_s5, 4  ;;  %s464_s7 = sshll.u32 %s648_s19, 8 }
  0x13   : > { %s878_s30 = scalar_select %p744_p11, 1, 0 }
  0x14   : > { %s755_s10 = scalar_lea.hbm %s869_s0, %s464_s7  ;;  %s182_s11 = scalar_lea.vmem [#allocation2], %s452_s6 }
  0x15   : > { %s190_s12 = sshll.u32 %s182_s11, 4  ;;  %p761_p0 = pnand %p484_p13, %p727_p4  ;;  %s757_s12 = int_to_ptr.vmem [resolvable:$true] %s190_s12 }
  0x16   : > { %s766_s14 = scalar_lea.sflag [#allocation3], %s178_s5  ;;  %s540_s21 = scalar_lea.hbm %s755_s10, 256 }
  0x17   : > { %p541_p2 = scmp.ne.s32.totalorder %s755_s10, %s540_s21  ;;  %p542_p3 = pneg %p761_p0 }
  0x18   : > { %s545_s25 = scalar_lea.hbm %s869_s0, 512  ;;  %p546_p4 = scmp.lt.u32.totalorder %s755_s10, %s869_s0 }
  0x19   : > { %p543_p5 = pnand %p542_p3, %p541_p2  ;;  %p547_p7 = scmp.lt.u32.totalorder %s545_s25, %s540_s21 }
  0x1a   : > { %p549_p13 = scmp.lt.u32.totalorder %s540_s21, %s755_s10 }
  0x1b   : > { %p544_p6 = pneg %p543_p5  ;;  %p548_p10 = por %p547_p7, %p546_p4 }
  0x1d   : > { %p550_p12 = por %p549_p13, %p548_p10 }
  0x1f   : > { %p551_p1 = pnand %p550_p12, %p544_p6 }
  0x21   : > { %554 = shalt.err (!%p551_p1)
}
  0x22   : > { %s555_s5 = scalar_lea.vmem %s757_s12, 256  ;;  %s654_s7 = smov [#allocation2]  }
  0x23   : > { %p556_p2 = scmp.ne.s32.totalorder %s757_s12, %s555_s5  ;;  %s560_s8 = sshll.u32 %s654_s7, 4  ;;  %s561_s8 = int_to_ptr.vmem [resolvable:$false] %s560_s8 }
  0x24   : > { %s562_s9 = scalar_lea.vmem %s561_s8, 512  ;;  %p563_p9 = scmp.lt.s32.totalorder %s757_s12, %s561_s8 }
  0x25   : > { %p558_p5 = pnand %p556_p2, %p542_p3  ;;  %p564_p4 = scmp.lt.s32.totalorder %s562_s9, %s555_s5 }
  0x27   : > { %p559_p11 = pneg %p558_p5  ;;  %p565_p7 = por %p564_p4, %p563_p9 }
  0x29   : > { %p566_p10 = pnand %p565_p7, %p559_p11 }
  0x2b   : > { %569 = shalt.err (!%p566_p10)
}
  0x2c   : > { %s655_s11 = smov 64   ;;  %s656_s21 = smov 4  }
  0x2d   : > { %479 = dma.hbm_to_vmem [thread:$0]  (!%p761_p0), %s755_s10, 256, %s757_s12, %s766_s14, %s655_s11, %s655_s11, %s656_s21  }
  0x2e   : > { %p198_p12 = scmp.lt.s32.totalorder %s652_s20, 3  ;;  %p880_p1 = scmp.ge.s32.totalorder %s652_s20, 1 }
  0x30   : > { %p199_p3 = pnand %p880_p1, %p198_p12 }
  0x31   : > { %s798_s22 = sand.u32 (!%p199_p3), 1, %s636_s16  }
  0x32   : > { %202 = sbr.rel (%p199_p3) target bundleno = 432 (0x1b0), region = 36  ;;  %s456_s24 = sshll.u32 (!%p199_p3), %s798_s22, 4 }
  0x33   : > { %s205_s25 = scalar_lea.sflag (!%p199_p3), [#allocation3], %s798_s22  ;;  %s208_s26 = scalar_lea.vmem (!%p199_p3), [#allocation2], %s456_s24 }
  0x39   : > { %623 = dma.done.wait (%p733_p8), %s205_s25, 256  }
  0x3a   : > { %625 = vsyncadd (%p733_p8), %s205_s25, 4294967040  ;;  %v657_v0 = vmov 0   ;;  %v237_v1 = vld [vmem:[%s870_s1] sm:$0xf]  ;;  %v658_v3 = vmov 0.0   ;;  %vm659_vm0 = vmmov 0  }
  0x3b   : > { %539 = vset.pattern.permute.xlu0 %v657_v0  ;;  %v238_v2 = vld [vmem:[%s871_s2] sm:$0xf]  ;;  %467 = vmatprep.subr.mxu0 %v658_v3  ;;  %v234_v6 = vld [vmem:[%s208_s26 + $0x4] sm:$0xf]  ;;  %v235_v7 = vld [vmem:[%s208_s26 + $0x8] sm:$0xf] }
  0x3c   : > { %241 = vperm.xlu0 %539, %v237_v1   ;;  %469 = vmatprep.mubr.msk.f32.mxu0 %vm659_vm0, %v658_v3  ;;  %v233_v4 = vld [vmem:[%s208_s26] sm:$0xf]  ;;  %v236_v8 = vld [vmem:[%s208_s26 + $0xc] sm:$0xf]  ;;  %vm261_vm1 = vcmask 519168   ;;  %vm276_vm2 = vcmask 1043456  }
  0x3d   : > { %v271_v30 = vld [vmem:[%s872_s3] sm:$0xff]  ;;  %vm272_vm3 = vcmask 31744   ;;  %s457_s5 = sshll.u32 %s798_s22, 3  ;;  %s461_s7 = sshll.u32 %s644_s18, 7  ;;  %vm350_vm4 = vcmask 523264  }
  0x3e   : > { %s232_s8 = scalar_lea.vmem [#allocation5], %s457_s5  ;;  %s820_s24 = scalar_lea.hbm %s873_s4, %s461_s7 }
  0x3f   : > { %s367_s9 = sshll.u32 %s232_s8, 4  ;;  %s353_s25 = scalar_lea.sflag [#allocation4], %s798_s22  ;;  %s822_s9 = int_to_ptr.vmem [resolvable:$true] %s367_s9 }
  0x40   : > { %250 = vperm.xlu0 %539, %v238_v2   ;;  %s570_s26 = scalar_lea.vmem %s822_s9, 128  ;;  %p881_p9 = scmp.ne.s32.totalorder %s877_s28, 0 }
  0x41   : > { %p571_p8 = scmp.ne.s32.totalorder %s822_s9, %s570_s26  ;;  %s660_s18 = smov [#allocation5]  }
  0x42   : > { %s574_s10 = sshll.u32 %s660_s18, 4  ;;  %s575_s10 = int_to_ptr.vmem [resolvable:$false] %s574_s10 }
  0x43   : > { %p572_p11 = pnand %p571_p8, %p881_p9  ;;  %s576_s12 = scalar_lea.vmem %s575_s10, 256 }
  0x44   : > { %p577_p6 = scmp.lt.s32.totalorder %s822_s9, %s575_s10  ;;  %p578_p13 = scmp.lt.s32.totalorder %s576_s12, %s570_s26 }
  0x45   : > { %p573_p0 = pneg %p572_p11 }
  0x46   : > { %p579_p2 = por %p578_p13, %p577_p6 }
  0x48   : > { %p580_p5 = pnand %p579_p2, %p573_p0 }
  0xbb   : > { %v242_v5 = vpop.permute.xlu0 %241 }
  0xbc   : > { %v244_v9 = vmul.f32 %v242_v5, %v233_v4  ;;  %v245_v10 = vmul.f32 %v242_v5, %v234_v6  ;;  %v246_v11 = vmul.f32 %v242_v5, %v235_v7  ;;  %v247_v12 = vmul.f32 %v242_v5, %v236_v8 }
  0xbf   : > { %v251_v13 = vpop.permute.xlu0 %250 }
  0xc0   : > { %v253_v14 = vadd.f32 %v251_v13, %v244_v9  ;;  %v254_v15 = vadd.f32 %v251_v13, %v245_v10  ;;  %v255_v16 = vadd.f32 %v251_v13, %v246_v11  ;;  %v256_v17 = vadd.f32 %v251_v13, %v247_v12 }
  0xc2   : > { %v257_v18 = vmax.f32 %v253_v14, 0.0  ;;  %v258_v19 = vmax.f32 %v254_v15, 0.0  ;;  %v259_v20 = vmax.f32 %v255_v16, 0.0  ;;  %v260_v21 = vmax.f32 %v256_v17, 0.0 }
  0xc4   : > { %v262_v22 = vsel %vm261_vm1, %v257_v18, 0.0  ;;  %v263_v23 = vsel %vm261_vm1, %v258_v19, 0.0  ;;  %v265_v25 = vsel %vm261_vm1, %v259_v20, 0.0  ;;  %v267_v27 = vsel %vm261_vm1, %v260_v21, 0.0 }
  0xc5   : > { %v264_v24 = vadd.f32 %v263_v23, %v262_v22 }
  0xc7   : > { %v266_v26 = vadd.f32 %v265_v25, %v264_v24 }
  0xc9   : > { %v268_v28 = vadd.f32 %v267_v27, %v266_v26 }
  0xcb   : > { %v270_v29 = vmul.f32 0.25, %v268_v28 }
  0xcd   : > { %468 = vmatpush3.msk.msra.mxu0 %vm276_vm2, %v270_v29 }
  0xce   : > { %470 = vmatmul.mubr.msk.f32.vlgmr.msra.gmra.mrb[0].mxu0 %vm272_vm3, %v271_v30 }
 0x1a1   : > { %v346_v31 = vpop.f32.mrb[0].mxu0 }
 0x1a2   : > { %351 = vst.msk [vmem:[%s232_s8] sm:$0xff] %vm350_vm4, %v346_v31  ;;  %v471_v32 = vpop.f32.mrb[1].mxu0 }
 0x1a3   : > { %583 = shalt.err (!%p580_p5)
}
 0x1a4   : > { %s584_s22 = scalar_lea.hbm %s820_s24, 128  ;;  %s588_s27 = scalar_lea.hbm %s873_s4, 256 }
 0x1a5   : > { %p585_p4 = scmp.ne.s32.totalorder %s820_s24, %s584_s22  ;;  %p589_p12 = scmp.lt.u32.totalorder %s820_s24, %s873_s4 }
 0x1a6   : > { %p590_p1 = scmp.lt.u32.totalorder %s588_s27, %s584_s22  ;;  %p592_p8 = scmp.lt.u32.totalorder %s584_s22, %s820_s24 }
 0x1a7   : > { %p586_p7 = pnand %p585_p4, %p881_p9 }
 0x1a8   : > { %p591_p3 = por %p590_p1, %p589_p12 }
 0x1a9   : > { %p587_p10 = pneg %p586_p7 }
 0x1aa   : > { %p593_p11 = por %p592_p8, %p591_p3 }
 0x1ac   : > { %p594_p0 = pnand %p593_p11, %p587_p10 }
 0x1ae   : > { %597 = shalt.err (!%p594_p0)
}
 0x1af   : > { %474 = dma.vmem_to_hbm [thread:$0]  (%p881_p9), %s822_s9, 128, %s820_s24, %s353_s25  }
 0x1b0 PF: > { %s379_s7 = sand.u32 1, %s632_s15   ;;  %p882_p6 = scmp.ne.s32.totalorder %s878_s30, 0 }
 0x1b1   : > { %p883_p13 = scmp.ge.s32.totalorder %s652_s20, 2  ;;  %s380_s8 = scalar_lea.sflag [#allocation4], %s379_s7 }
 0x1b3   : > { %p481_p2 = pnand %p883_p13, %p882_p6 }
 0x1b5   : > { %627 = dma.done.wait (!%p481_p2), %s380_s8, 128  }
 0x1b6   : > { %629 = vsyncadd (!%p481_p2), %s380_s8, 4294967168  ;;  %s20_s20 = sadd.s32 1, %s652_s20   ;;  %s884_s15 = smov %s636_s16 }
 0x1b7   : > { %p17_p5 = scmp.ge.s32.totalorder %s20_s20, 4   ;;  %s885_s16 = smov %s640_s17 }
 0x1b8   : > { %s886_s17 = smov %s742_s29  ;;  %s887_s18 = smov %s648_s19 }
 0x1b9   : > { %s888_s19 = smov %s890_s23  ;;  %19 = sbr.rel (!%p17_p5) target bundleno = 6 (0x6), region = 81 }
 0x1c0   :  { %385 = vsyncpa [#allocation3], 1 }
 0x1c1   :  { %387 = vsyncpa [#allocation3 + $0x1], 1 }
 0x1c2   :  { %388 = vsyncpa [#allocation4], 1 }
 0x1c3   :  { %390 = vsyncpa [#allocation4 + $0x1], 1 }

</bundles_post_ra>
